<compile_context>
chip_gen: v7x
topology: tpu7x:2x2x1
jax: 0.10.0
libtpu: 0.0.40
codegen_flags: <defaults>
</compile_context>

<pallas_src>
import jax
import jax.numpy as jnp
from jax.experimental import pallas as pl
from jax.experimental.pallas import tpu as pltpu

H = 512  # hidden width of fc1 / input width of fc2


def mlp_kernel(x_ref, p_ref, o_ref):
    x = x_ref[...]                                   # (B, 3)   f32, VMEM
    w1 = p_ref[0:3, :]                               # (3, H)   static slice
    b1 = p_ref[3:4, :]                               # (1, H)
    w2 = p_ref[4:5, :]                               # (1, H)
    b2 = p_ref[5:6, 0:1]                             # (1, 1)   fc2 bias scalar

    # fc1: K=3 contraction as three broadcast FMAs on the VPU (+ bias).
    h = (x[:, 0:1] * w1[0:1, :]
         + x[:, 1:2] * w1[1:2, :]
         + x[:, 2:3] * w1[2:3, :]
         + b1)                                       # (B, H)
    h = jnp.maximum(h, 0.0)                          # ReLU

    # fc2: N=1 as elementwise multiply + lane reduce (XLU), bias add.
    y = jnp.sum(h * w2, axis=-1, keepdims=True)      # (B, 1)
    o_ref[...] = (y + b2).astype(o_ref.dtype)


@jax.jit
def mlp_forward(x, params):
    """x: (B, 3) f32; params: (6, H) packed slab. Returns (B, 1)."""
    B = x.shape[0]
    bytes_accessed = (x.size + params.size + B) * 4
    flops = 2 * B * 3 * H + 2 * B * H
    return pl.pallas_call(
        mlp_kernel,
        out_shape=jax.ShapeDtypeStruct((B, 1), jnp.float32),
        in_specs=[
            pl.BlockSpec(memory_space=pltpu.MemorySpace.VMEM),   # x
            pl.BlockSpec(memory_space=pltpu.MemorySpace.VMEM),   # packed params
        ],
        out_specs=pl.BlockSpec(memory_space=pltpu.MemorySpace.VMEM),
        cost_estimate=pl.CostEstimate(
            flops=flops, transcendentals=0, bytes_accessed=bytes_accessed),
    )(x, params)


def init_params(key):
    # Deterministic init mimicking torch.nn.Linear default:
    # U(-1/sqrt(fan_in), 1/sqrt(fan_in)).
    k1, k2, k3, k4 = jax.random.split(key, 4)
    fan1, fan2 = 3, H
    bound1 = 1.0 / jnp.sqrt(fan1)
    bound2 = 1.0 / jnp.sqrt(fan2)
    w1 = jax.random.uniform(k1, (3, H), jnp.float32, -bound1, bound1)   # (in, out)
    b1 = jax.random.uniform(k2, (1, H), jnp.float32, -bound1, bound1)
    w2 = jax.random.uniform(k3, (1, H), jnp.float32, -bound2, bound2)   # fc2 weight row
    b2 = jax.random.uniform(k4, (1,), jnp.float32, -bound2, bound2)     # fc2 bias scalar
    return w1, b1, w2, b2


def pack_params(w1, b1, w2_row, b2):
    """Pack w1 (3,H), b1 (1,H), w2 (1,H) and b2 (lane 0 of row 5) into (6,H)."""
    b2_row = jnp.zeros((1, H), jnp.float32).at[0, 0].set(b2[0])
    return jnp.concatenate([w1, b1, w2_row, b2_row], axis=0)  # (6, H)


if __name__ == "__main__":
    key = jax.random.PRNGKey(0)
    kx, kp = jax.random.split(key)
    B = 8
    x = jax.random.normal(kx, (B, 3), jnp.float32)
    w1, b1, w2, b2 = init_params(kp)
    params = jax.block_until_ready(pack_params(w1, b1, w2, b2))  # pack once, outside jit

    out = mlp_forward(x, params)
    out = jax.block_until_ready(out)

    # Reference in plain JAX (same math as fc2(relu(fc1(x)))).
    h_ref = jnp.maximum(x @ w1 + b1, 0.0)
    ref = jnp.sum(h_ref * w2, axis=-1, keepdims=True) + b2
    assert out.shape == (B, 1)
    assert jnp.allclose(out, ref, atol=1e-5, rtol=1e-5)

    print("KERNEL_OK")
</pallas_src>

<mosaic_0001>
module attributes {stable_mosaic.version = 11 : i64} {
  func.func @mlp_kernel(%arg0: memref<8x3xf32, #tpu.memory_space<vmem>>, %arg1: memref<6x512xf32, #tpu.memory_space<vmem>>, %arg2: memref<8x1xf32, #tpu.memory_space<vmem>>) attributes {dimension_semantics = [], scalar_prefetch = 0 : i64, scratch_operands = 0 : i64, tpu.core_type = #tpu.core_type<tc>} {
    %c0 = arith.constant 0 : index
    %c0_0 = arith.constant 0 : index
    %0 = vector.load %arg0[%c0, %c0_0] : memref<8x3xf32, #tpu.memory_space<vmem>>, vector<8x3xf32>
    %c0_1 = arith.constant 0 : index
    %c0_2 = arith.constant 0 : index
    %1 = vector.load %arg1[%c0_1, %c0_2] : memref<6x512xf32, #tpu.memory_space<vmem>>, vector<3x512xf32>
    %c3 = arith.constant 3 : index
    %c0_3 = arith.constant 0 : index
    %2 = vector.load %arg1[%c3, %c0_3] : memref<6x512xf32, #tpu.memory_space<vmem>>, vector<1x512xf32>
    %c4 = arith.constant 4 : index
    %c0_4 = arith.constant 0 : index
    %3 = vector.load %arg1[%c4, %c0_4] : memref<6x512xf32, #tpu.memory_space<vmem>>, vector<1x512xf32>
    %c5 = arith.constant 5 : index
    %c0_5 = arith.constant 0 : index
    %4 = vector.load %arg1[%c5, %c0_5] : memref<6x512xf32, #tpu.memory_space<vmem>>, vector<1x1xf32>
    %5 = vector.extract_strided_slice %0 {offsets = [0, 0], sizes = [8, 1], strides = [1, 1]} : vector<8x3xf32> to vector<8x1xf32>
    %6 = vector.extract_strided_slice %1 {offsets = [0, 0], sizes = [1, 512], strides = [1, 1]} : vector<3x512xf32> to vector<1x512xf32>
    %7 = vector.broadcast %5 : vector<8x1xf32> to vector<8x512xf32>
    %8 = vector.broadcast %6 : vector<1x512xf32> to vector<8x512xf32>
    %9 = arith.mulf %7, %8 : vector<8x512xf32>
    %10 = vector.extract_strided_slice %0 {offsets = [0, 1], sizes = [8, 1], strides = [1, 1]} : vector<8x3xf32> to vector<8x1xf32>
    %11 = vector.extract_strided_slice %1 {offsets = [1, 0], sizes = [1, 512], strides = [1, 1]} : vector<3x512xf32> to vector<1x512xf32>
    %12 = vector.broadcast %10 : vector<8x1xf32> to vector<8x512xf32>
    %13 = vector.broadcast %11 : vector<1x512xf32> to vector<8x512xf32>
    %14 = arith.mulf %12, %13 : vector<8x512xf32>
    %15 = arith.addf %9, %14 : vector<8x512xf32>
    %16 = vector.extract_strided_slice %0 {offsets = [0, 2], sizes = [8, 1], strides = [1, 1]} : vector<8x3xf32> to vector<8x1xf32>
    %17 = vector.extract_strided_slice %1 {offsets = [2, 0], sizes = [1, 512], strides = [1, 1]} : vector<3x512xf32> to vector<1x512xf32>
    %18 = vector.broadcast %16 : vector<8x1xf32> to vector<8x512xf32>
    %19 = vector.broadcast %17 : vector<1x512xf32> to vector<8x512xf32>
    %20 = arith.mulf %18, %19 : vector<8x512xf32>
    %21 = arith.addf %15, %20 : vector<8x512xf32>
    %22 = vector.broadcast %2 : vector<1x512xf32> to vector<8x512xf32>
    %23 = arith.addf %21, %22 : vector<8x512xf32>
    %cst = arith.constant 0.000000e+00 : f32
    %24 = vector.broadcast %cst : f32 to vector<8x512xf32>
    %25 = arith.maximumf %23, %24 : vector<8x512xf32>
    %26 = vector.broadcast %3 : vector<1x512xf32> to vector<8x512xf32>
    %27 = arith.mulf %25, %26 : vector<8x512xf32>
    %cst_6 = arith.constant dense<0.000000e+00> : vector<8xf32>
    %28 = vector.multi_reduction <add>, %27, %cst_6 [1] : vector<8x512xf32> to vector<8xf32>
    %29 = vector.shape_cast %28 : vector<8xf32> to vector<8x1xf32>
    %30 = vector.broadcast %4 : vector<1x1xf32> to vector<8x1xf32>
    %31 = arith.addf %29, %30 : vector<8x1xf32>
    %c0_7 = arith.constant 0 : index
    %c0_8 = arith.constant 0 : index
    %32 = vector.load %arg2[%c0_7, %c0_8] : memref<8x1xf32, #tpu.memory_space<vmem>>, vector<8x1xf32>
    tpu.vector_store %arg2[%c0_7, %c0_8], %31 {strides = array<i32>} : memref<8x1xf32, #tpu.memory_space<vmem>>, vector<8x1xf32>,
    return
  }
}

</mosaic_0001>

<bundles_post_ra>
// kernel: mlp_forward.1
= control target key start
LH: loop header
LB: loop body
LE: loop exit
PB: predicated region body
PF: predicated region fallthrough
CT: control target
= control target key end

     0   :  { %7 = vsyncpa [#allocation3], 0  ;;  %s213_s9 = smov [#allocation2]   ;;  %s250_s0 = inlined_call_operand.vmem [shape: f32[8,3], index: 0, kind: input, shape index: {}]   ;;  %s251_s1 = inlined_call_operand.hbm [shape: f32[6,512], index: 1, kind: input, shape index: {}]   ;;  %s252_s2 = inlined_call_operand.vmem [shape: f32[8,1], index: 2, kind: output, shape index: {}]  }
   0x1   :  { %s16_s10 = sshll.u32 %s213_s9, 4  ;;  %s189_s13 = scalar_lea.hbm %s251_s1, 512  ;;  %s17_s10 = int_to_ptr.vmem [resolvable:$true] %s16_s10 }
   0x2   :  { %p190_p0 = scmp.ne.s32.totalorder %s251_s1, %s189_s13  ;;  %p193_p1 = scmp.lt.u32.totalorder %s189_s13, %s251_s1 }
   0x4   :  { %p195_p2 = pnand %p193_p1, %p190_p0 }
   0x6   :  { %198 = shalt.err (!%p195_p2)
}
   0x7   :  { %s199_s18 = scalar_lea.vmem %s17_s10, 512  ;;  %p204_p4 = scmp.lt.s32.totalorder %s17_s10, %s17_s10 }
   0x8   :  { %p200_p3 = scmp.ne.s32.totalorder %s17_s10, %s199_s18  ;;  %p205_p5 = scmp.lt.s32.totalorder %s199_s18, %s199_s18 }
   0xa   :  { %p206_p6 = por %p205_p5, %p204_p4 }
   0xc   :  { %p207_p7 = pnand %p206_p6, %p200_p3 }
   0xe   :  { %210 = shalt.err (!%p207_p7)
}
   0xf   :  { %19 = dma.hbm_to_vmem [thread:$0]  %s251_s1, 512, %s17_s10, [#allocation3]  }
  0x10   :  { %211 = dma.done.wait [#allocation3], 512  }
  0x11   :  { %212 = vsyncadd [#allocation3], 4294966784  ;;  %v214_v0 = vmov 0   ;;  %v215_v1 = vmov 2   ;;  %v23_v2 = vld [vmem:[%s250_s0] sm:$0xff]  ;;  %v216_v3 = vmov 1   ;;  %v38_v4 = vlaneseq }
  0x12   :  { %185 = vset.pattern.permute.xlu0 %v214_v0  ;;  %187 = vset.pattern.permute.xlu1 %v215_v1  ;;  %v24_v6 = vld [vmem:[#allocation2] sm:$0x7]  ;;  %v25_v7 = vld [vmem:[#allocation2 + $0x8] sm:$0x7]  ;;  %v26_v9 = vld [vmem:[#allocation2 + $0x10] sm:$0x7] }
  0x13   :  { %35 = vperm.xlu0 %185, %v23_v2   ;;  %87 = vperm.xlu1 %187, %v23_v2   ;;  %v39_v5 = vshrl.u32 %v38_v4, 7  ;;  %v27_v10 = vld [vmem:[#allocation2 + $0x18] sm:$0x7]  ;;  %v29_v32 = vld [vmem:[#allocation2 + $0x3] ss:$8 sm:$0xf] }
  0x14   :  { %v31_v50 = vld [vmem:[#allocation2 + $0x4] ss:$8 sm:$0xf]  ;;  %vm174_vm0 = vcmask 7168  }
  0x15   :  { %v40_v8 = vsub.s32 0, %v39_v5  ;;  %v92_v11 = vsub.s32 2, %v39_v5  ;;  %v64_v12 = vsub.s32 1, %v39_v5  ;;  %v129_v27 = vsub.s32 3, %v39_v5 }
  0x17   :  { %186 = vset.pattern.permute.xlu0 %v216_v3  ;;  %v41_v13 = vrot.slane %v24_v6, %v40_v8  ;;  %v45_v14 = vrot.slane %v25_v7, %v40_v8  ;;  %v49_v15 = vrot.slane %v26_v9, %v40_v8  ;;  %v53_v16 = vrot.slane %v27_v10, %v40_v8 }
  0x18   :  { %59 = vperm.xlu0 %186, %v23_v2   ;;  %v93_v18 = vrot.slane %v24_v6, %v92_v11  ;;  %v97_v19 = vrot.slane %v25_v7, %v92_v11  ;;  %v101_v20 = vrot.slane %v26_v9, %v92_v11  ;;  %v105_v21 = vrot.slane %v27_v10, %v92_v11 }
  0x19   :  { %v65_v22 = vrot.slane %v24_v6, %v64_v12  ;;  %v69_v23 = vrot.slane %v25_v7, %v64_v12  ;;  %v73_v24 = vrot.slane %v26_v9, %v64_v12  ;;  %v77_v25 = vrot.slane %v27_v10, %v64_v12 }
  0x1a   :  { %v118_v42 = vrot.slane %v29_v32, %v40_v8  ;;  %v122_v43 = vrot.slane %v29_v32, %v64_v12  ;;  %v126_v44 = vrot.slane %v29_v32, %v92_v11  ;;  %v130_v45 = vrot.slane %v29_v32, %v129_v27 }
  0x1b   :  { %v147_v55 = vrot.slane %v31_v50, %v40_v8  ;;  %v151_v56 = vrot.slane %v31_v50, %v64_v12  ;;  %v155_v0 = vrot.slane %v31_v50, %v92_v11  ;;  %v159_v2 = vrot.slane %v31_v50, %v129_v27  ;;  %v32_v8 = vld [vmem:[#allocation2 + $0x5] ss:$0 sm:$0xff] }
  0x1c   :  { %188 = vset.pattern.permute.xlu0 %v215_v1 }
  0x92   :  { %v36_v17 = vpop.permute.xlu0 %35  ;;  %v88_v26 = vpop.permute.xlu1 %87 }
  0x93   :  { %v54_v28 = vmul.f32 %v41_v13, %v36_v17  ;;  %v55_v29 = vmul.f32 %v45_v14, %v36_v17  ;;  %v56_v30 = vmul.f32 %v49_v15, %v36_v17  ;;  %v57_v31 = vmul.f32 %v53_v16, %v36_v17 }
  0x94   :  { %v106_v34 = vmul.f32 %v93_v18, %v88_v26  ;;  %v107_v35 = vmul.f32 %v97_v19, %v88_v26  ;;  %v108_v36 = vmul.f32 %v101_v20, %v88_v26  ;;  %v109_v37 = vmul.f32 %v105_v21, %v88_v26 }
  0x97   :  { %v60_v33 = vpop.permute.xlu0 %59 }
  0x98   :  { %v78_v38 = vmul.f32 %v65_v22, %v60_v33  ;;  %v79_v39 = vmul.f32 %v69_v23, %v60_v33  ;;  %v80_v40 = vmul.f32 %v73_v24, %v60_v33  ;;  %v81_v41 = vmul.f32 %v77_v25, %v60_v33 }
  0x9a   :  { %v82_v46 = vadd.f32 %v78_v38, %v54_v28  ;;  %v83_v47 = vadd.f32 %v79_v39, %v55_v29  ;;  %v84_v48 = vadd.f32 %v80_v40, %v56_v30  ;;  %v85_v49 = vadd.f32 %v81_v41, %v57_v31 }
  0x9c   :  { %v110_v51 = vadd.f32 %v106_v34, %v82_v46  ;;  %v111_v52 = vadd.f32 %v107_v35, %v83_v47  ;;  %v112_v53 = vadd.f32 %v108_v36, %v84_v48  ;;  %v113_v54 = vadd.f32 %v109_v37, %v85_v49 }
  0x9e   :  { %v135_v57 = vadd.f32 %v118_v42, %v110_v51  ;;  %v136_v58 = vadd.f32 %v122_v43, %v111_v52  ;;  %v137_v59 = vadd.f32 %v126_v44, %v112_v53  ;;  %v138_v60 = vadd.f32 %v130_v45, %v113_v54 }
  0xa0   :  { %v139_v61 = vmax.f32 %v135_v57, 0.0  ;;  %v140_v62 = vmax.f32 %v136_v58, 0.0  ;;  %v141_v63 = vmax.f32 %v137_v59, 0.0  ;;  %v142_v1 = vmax.f32 %v138_v60, 0.0 }
  0xa2   :  { %v164_v3 = vmul.f32 %v147_v55, %v139_v61  ;;  %v165_v4 = vmul.f32 %v151_v56, %v140_v62  ;;  %v166_v5 = vmul.f32 %v155_v0, %v141_v63  ;;  %v167_v7 = vmul.f32 %v159_v2, %v142_v1 }
  0xa4   :  { %v168_v6 = vadd.f32 %v165_v4, %v164_v3 }
  0xa6   :  { %v169_v9 = vadd.f32 %v168_v6, %v166_v5 }
  0xa8   :  { %v170_v10 = vadd.f32 %v169_v9, %v167_v7 }
  0xaa   :  { %171 = vadd.xlane.f32.xlu1 %v170_v10 }
 0x137   :  { %v172_v12 = vpop.xlane.xlu1 %171 }
 0x138   :  { %v173_v13 = vadd.f32 %v172_v12, %v32_v8 }
 0x13a   :  { %175 = vst.msk [vmem:[%s252_s2] sm:$0xff] %vm174_vm0, %v173_v13 }
 0x13b   :  { %180 = vsyncpa [#allocation3], 1 }

</bundles_post_ra>
